<compile_context>
chip_gen: v7x
topology: tpu7x:2x2x1
jax: 0.10.0
libtpu: 0.0.40
codegen_flags: <defaults>
</compile_context>

<pallas_src>
import functools

import jax
import jax.numpy as jnp
from jax.experimental import pallas as pl
from jax.experimental.pallas import tpu as pltpu

_LANES = 128


def _tpu_tuning():
    """Return (max_tile_rows, n_tensorcores) for the current TPU generation."""
    kind = ""
    try:
        kind = jax.devices()[0].device_kind.lower()
    except Exception:
        pass
    # v7x (and megacore v4/v5p) expose 2 TensorCores that a "parallel" grid
    # axis can shard across; v5e/v6e have a single TC -> skip the core split.
    two_cores = ("v7" in kind) or ("v4" in kind) or ("v5p" in kind)
    # A (tile_rows,128) f32 block is tile_rows/256 KiB.  4096 rows -> 2 MiB
    # blocks (reduce ~10 MiB, 'none' ~12 MiB VMEM) fits the 32 MiB scoped
    # default on v6e/v7x; 2048 rows (~6 MiB) fits v5e's 16 MiB default.
    max_tile_rows = 4096 if (("v6" in kind) or ("v7" in kind)) else 2048
    return max_tile_rows, (2 if two_cores else 1)


def _poly1_elementwise(x, z, alpha):
    # Single exp per element: e = exp(-|x|) feeds both the numerically-stable
    # BCE term log1p(e) and sigmoid(x) = where(x>=0, 1, e) / (1 + e).
    e = jnp.exp(-jnp.abs(x))
    bce = jnp.maximum(x, 0.0) - x * z + jnp.log1p(e)
    p = jnp.where(x >= 0.0, 1.0, e) / (1.0 + e)        # exact divide (f32 tol)
    # 1 - pt = 1 - (z*p + (1-z)*(1-p)) = z + p - 2*z*p   (fewer VALU ops)
    return bce + alpha * (z + p - 2.0 * (z * p))


def _reduce_kernel(pred_ref, tgt_ref, out_ref, acc_ref, *, alpha, n_valid,
                   tile_rows, chunks, total_blocks):
    c = pl.program_id(0)        # core-split ("parallel") axis
    i = pl.program_id(1)        # streaming ("arbitrary") axis
    block_idx = c * chunks + i
    last = total_blocks - 1     # static: the only block that needs a tail mask

    @pl.when(i == 0)
    def _():
        acc_ref[...] = jnp.zeros_like(acc_ref)

    # Hot path: fully-valid blocks are a plain unmasked lane-parallel add.
    @pl.when(block_idx < last)
    def _():
        x = pred_ref[...].astype(jnp.float32)
        z = tgt_ref[...].astype(jnp.float32)
        acc_ref[...] += _poly1_elementwise(x, z, alpha)

    # Boundary block: mask out the lane-pad zeros and any stale rows left by
    # the clipped partial-block DMA.
    @pl.when(block_idx == last)
    def _():
        x = pred_ref[...].astype(jnp.float32)
        z = tgt_ref[...].astype(jnp.float32)
        loss = _poly1_elementwise(x, z, alpha)
        base = last * tile_rows * _LANES                       # static offset
        row = jax.lax.broadcasted_iota(jnp.int32, (tile_rows, _LANES), 0)
        lane = jax.lax.broadcasted_iota(jnp.int32, (tile_rows, _LANES), 1)
        valid = (base + row * _LANES + lane) < n_valid
        acc_ref[...] += jnp.where(valid, loss, 0.0)

    # Blocks with block_idx > last only occur when the 2-core split does not
    # divide total_blocks evenly; their index_map is clamped (in-bounds DMA)
    # and they are simply skipped.

    @pl.when(i == pl.num_programs(1) - 1)
    def _():
        a = acc_ref[...]
        # Fold (tile_rows,128) -> (8,128) partial sums; layout-preserving
        # sublane split, done once per core.
        out_ref[...] = a.reshape(tile_rows // 8, 8, _LANES).sum(axis=0)


def _elem_kernel(pred_ref, tgt_ref, out_ref, *, alpha):
    x = pred_ref[...].astype(jnp.float32)
    z = tgt_ref[...].astype(jnp.float32)
    out_ref[...] = _poly1_elementwise(x, z, alpha).astype(out_ref.dtype)


def _flatten_pad(a, padded_elems):
    """Flatten to 1D (original dtype), pad only the tail, reshape to 2D."""
    flat = a.reshape(-1)
    pad = padded_elems - flat.shape[0]
    if pad:   # only the 128-lane tail (or a few rows for tiny inputs)
        flat = jnp.pad(flat, (0, pad))
    return flat.reshape(padded_elems // _LANES, _LANES)


def binary_poly1_loss_with_logits(prediction, target, alpha=1.0, reduction="mean"):
    if reduction not in ("mean", "sum", "none"):
        raise ValueError(f"Incorrect reduction: {reduction}")
    orig_shape = prediction.shape
    orig_dtype = prediction.dtype
    n = int(prediction.size)

    if n == 0:
        if reduction == "none":
            return jnp.zeros(orig_shape, orig_dtype)
        if reduction == "sum":
            return jnp.zeros((), orig_dtype)
        return jnp.full((), jnp.nan, orig_dtype)   # torch: mean of empty -> nan

    alpha = float(alpha)
    rows = pl.cdiv(n, _LANES)
    max_tile_rows, n_tc = _tpu_tuning()

    if reduction in ("mean", "sum"):
        if rows > max_tile_rows:
            tile_rows = max_tile_rows            # multiple of 8
            rows_eff = rows                      # no row pad; last block partial
        else:
            # Tiny input: one block; round rows up to a sublane multiple so the
            # (tile_rows//8, 8, 128) finalize fold is valid (pad is negligible).
            tile_rows = max(8, pl.cdiv(rows, 8) * 8)
            rows_eff = tile_rows
        total_blocks = pl.cdiv(rows_eff, tile_rows)

        n_par = n_tc if total_blocks >= n_tc else 1
        chunks = pl.cdiv(total_blocks, n_par)

        pred2d = _flatten_pad(prediction, rows_eff * _LANES)
        tgt2d = _flatten_pad(target, rows_eff * _LANES)

        if n_par * chunks > total_blocks:
            # Rare overhanging step of the 2-core split: clamp its block index
            # so the DMA stays in bounds; the kernel skips its accumulate.
            def idx(c, i, _chunks=chunks, _last=total_blocks - 1):
                return (jnp.minimum(c * _chunks + i, _last), 0)
        else:
            def idx(c, i, _chunks=chunks):
                return (c * _chunks + i, 0)

        in_block = pl.BlockSpec((tile_rows, _LANES), idx)
        out_block = pl.BlockSpec((8, _LANES), lambda c, i: (c, 0))

        partial = pl.pallas_call(
            functools.partial(_reduce_kernel, alpha=alpha, n_valid=n,
                              tile_rows=tile_rows, chunks=chunks,
                              total_blocks=total_blocks),
            out_shape=jax.ShapeDtypeStruct((n_par * 8, _LANES), jnp.float32),
            grid_spec=pltpu.PrefetchScalarGridSpec(
                num_scalar_prefetch=0,
                grid=(n_par, chunks),
                in_specs=[in_block, in_block],
                out_specs=out_block,
                scratch_shapes=[pltpu.VMEM((tile_rows, _LANES), jnp.float32)],
            ),
            compiler_params=pltpu.CompilerParams(
                dimension_semantics=("parallel", "arbitrary")),
        )(pred2d, tgt2d)

        total = jnp.sum(partial)            # tiny (n_par*8, 128) combine
        if reduction == "mean":
            total = total / n
        return total.astype(orig_dtype)

    # reduction == "none": per-element loss, written in the original dtype.
    tile_rows = rows if rows <= max_tile_rows else max_tile_rows
    total_blocks = pl.cdiv(rows, tile_rows)

    pred2d = _flatten_pad(prediction, rows * _LANES)
    tgt2d = _flatten_pad(target, rows * _LANES)
    block = pl.BlockSpec((tile_rows, _LANES), lambda i: (i, 0))

    out = pl.pallas_call(
        functools.partial(_elem_kernel, alpha=alpha),
        out_shape=jax.ShapeDtypeStruct((rows, _LANES), orig_dtype),
        grid_spec=pltpu.PrefetchScalarGridSpec(
            num_scalar_prefetch=0,
            grid=(total_blocks,),
            in_specs=[block, block],
            out_specs=block,
        ),
        compiler_params=pltpu.CompilerParams(dimension_semantics=("parallel",)),
    )(pred2d, tgt2d)

    if rows * _LANES != n:                  # slice only when a lane tail exists
        out = out.reshape(-1)[:n]
    return out.reshape(orig_shape)


class BinaryPoly1LossWithLogits:
    """JAX/Pallas port of karbonn.modules.BinaryPoly1LossWithLogits."""

    def __init__(self, alpha: float = 1.0, reduction: str = "mean") -> None:
        self._alpha = float(alpha)
        if reduction not in ("mean", "sum", "none"):
            raise ValueError(f"Incorrect reduction: {reduction}")
        self.reduction = reduction

    def __repr__(self) -> str:
        return f"BinaryPoly1LossWithLogits(alpha={self._alpha}, reduction={self.reduction})"

    def __call__(self, prediction, target):
        return binary_poly1_loss_with_logits(
            prediction=prediction,
            target=target,
            alpha=self._alpha,
            reduction=self.reduction,
        )


def _reference(prediction, target, alpha, reduction):
    # Independent formulation (does not reuse the kernel's exp-sharing trick).
    x = prediction.astype(jnp.float32)
    z = target.astype(jnp.float32)
    bce = jnp.maximum(x, 0.0) - x * z + jnp.log1p(jnp.exp(-jnp.abs(x)))
    p = jax.nn.sigmoid(x)
    pt = z * p + (1.0 - z) * (1.0 - p)
    loss = bce + alpha * (1.0 - pt)
    if reduction == "mean":
        return jnp.mean(loss)
    if reduction == "sum":
        return jnp.sum(loss)
    return loss


if __name__ == "__main__":
    key = jax.random.PRNGKey(0)
    kp, kt = jax.random.split(key)

    # Module accepts any shape (*); use a small NCHW-like tensor.
    prediction = jax.random.normal(kp, (2, 4, 16, 16), dtype=jnp.float32)
    target = jax.random.bernoulli(kt, 0.5, (2, 4, 16, 16)).astype(jnp.float32)

    # mean / sum / none, f32
    for red in ("mean", "sum", "none"):
        crit = BinaryPoly1LossWithLogits(alpha=1.0, reduction=red)
        loss = crit(prediction, target)
        jax.block_until_ready(loss)
        ref = _reference(prediction, target, 1.0, red)
        if red == "none":
            assert loss.shape == prediction.shape
        assert jnp.allclose(loss.astype(jnp.float32), ref, rtol=1e-5, atol=1e-5), (red, loss, ref)

    # Non-multiple-of-128 element count exercises the lane-tail mask / slice.
    p2 = jax.random.normal(jax.random.PRNGKey(1), (3, 7, 5), dtype=jnp.float32)
    t2 = jax.random.bernoulli(jax.random.PRNGKey(2), 0.5, (3, 7, 5)).astype(jnp.float32)
    loss2 = BinaryPoly1LossWithLogits(alpha=0.5, reduction="mean")(p2, t2)
    jax.block_until_ready(loss2)
    ref2 = _reference(p2, t2, 0.5, "mean")
    assert jnp.allclose(loss2, ref2, rtol=1e-5, atol=1e-5), (loss2, ref2)

    # Multi-block path: rows > max_tile_rows, partial last block, odd block
    # count (exercises the clamped index_map on 2-TensorCore chips).
    p3 = jax.random.normal(jax.random.PRNGKey(3), (1237, 997), dtype=jnp.float32)
    t3 = jax.random.bernoulli(jax.random.PRNGKey(4), 0.5, (1237, 997)).astype(jnp.float32)
    loss3m = BinaryPoly1LossWithLogits(alpha=1.0, reduction="mean")(p3, t3)
    jax.block_until_ready(loss3m)
    ref3m = _reference(p3, t3, 1.0, "mean")
    assert jnp.allclose(loss3m, ref3m, rtol=1e-4, atol=1e-4), (loss3m, ref3m)
    loss3n = BinaryPoly1LossWithLogits(alpha=1.0, reduction="none")(p3, t3)
    jax.block_until_ready(loss3n)
    ref3n = _reference(p3, t3, 1.0, "none")
    assert loss3n.shape == p3.shape
    assert jnp.allclose(loss3n, ref3n, rtol=1e-5, atol=1e-5)

    # bf16 transport path (inputs and 'none' output stay bf16 end-to-end).
    pb = prediction.astype(jnp.bfloat16)
    tb = target.astype(jnp.bfloat16)
    loss_b = BinaryPoly1LossWithLogits(alpha=1.0, reduction="mean")(pb, tb)
    jax.block_until_ready(loss_b)
    ref_b = _reference(pb, tb, 1.0, "mean")
    assert jnp.allclose(loss_b.astype(jnp.float32), ref_b, rtol=2e-2, atol=2e-2)
    loss_bn = BinaryPoly1LossWithLogits(alpha=1.0, reduction="none")(pb, tb)
    jax.block_until_ready(loss_bn)
    assert loss_bn.dtype == jnp.bfloat16 and loss_bn.shape == pb.shape

    print("KERNEL_OK")
</pallas_src>

<mosaic_0001>
module attributes {stable_mosaic.version = 11 : i64} {
  func.func @_reduce_kernel(%arg0: i32, %arg1: i32, %arg2: memref<16x128xf32, #tpu.memory_space<vmem>>, %arg3: memref<16x128xf32, #tpu.memory_space<vmem>>, %arg4: memref<8x128xf32, #tpu.memory_space<vmem>>, %arg5: memref<16x128xf32, #tpu.memory_space<vmem>>) attributes {dimension_semantics = [#tpu.dimension_semantics<parallel>, #tpu.dimension_semantics<arbitrary>], iteration_bounds = array<i64: 1, 1>, scalar_prefetch = 0 : i64, scratch_operands = 1 : i64, tpu.core_type = #tpu.core_type<tc>, window_params = [{transform_indices = @transform_0, window_bounds = array<i64: 16, 128>}, {transform_indices = @transform_1, window_bounds = array<i64: 16, 128>}, {transform_indices = @transform_2, window_bounds = array<i64: 8, 128>}]} {
    %c1_i32 = arith.constant 1 : i32
    %0 = arith.muli %arg0, %c1_i32 : i32
    %1 = arith.addi %0, %arg1 : i32
    %c0_i32 = arith.constant 0 : i32
    %2 = arith.cmpi eq, %arg1, %c0_i32 : i32
    %3 = arith.extui %2 : i1 to i32
    %c0_i32_0 = arith.constant 0 : i32
    %4 = arith.cmpi ne, %3, %c0_i32_0 : i32
    scf.if %4 {
      %cst = arith.constant 0.000000e+00 : f32
      %14 = vector.broadcast %cst : f32 to vector<16x128xf32>
      %c0 = arith.constant 0 : index
      %c0_7 = arith.constant 0 : index
      %15 = vector.load %arg5[%c0, %c0_7] : memref<16x128xf32, #tpu.memory_space<vmem>>, vector<16x128xf32>
      tpu.vector_store %arg5[%c0, %c0_7], %14 {strides = array<i32>} : memref<16x128xf32, #tpu.memory_space<vmem>>, vector<16x128xf32>,
    } else {
    }
    %c0_i32_1 = arith.constant 0 : i32
    %5 = arith.cmpi slt, %1, %c0_i32_1 : i32
    %6 = arith.extui %5 : i1 to i32
    %c0_i32_2 = arith.constant 0 : i32
    %7 = arith.cmpi ne, %6, %c0_i32_2 : i32
    scf.if %7 {
      %c0 = arith.constant 0 : index
      %c0_7 = arith.constant 0 : index
      %14 = vector.load %arg2[%c0, %c0_7] : memref<16x128xf32, #tpu.memory_space<vmem>>, vector<16x128xf32>
      %c0_8 = arith.constant 0 : index
      %c0_9 = arith.constant 0 : index
      %15 = vector.load %arg3[%c0_8, %c0_9] : memref<16x128xf32, #tpu.memory_space<vmem>>, vector<16x128xf32>
      %c0_10 = arith.constant 0 : index
      %c0_11 = arith.constant 0 : index
      %16 = vector.load %arg5[%c0_10, %c0_11] : memref<16x128xf32, #tpu.memory_space<vmem>>, vector<16x128xf32>
      %17 = math.absf %14 : vector<16x128xf32>
      %cst = arith.constant 0.000000e+00 : f32
      %18 = vector.broadcast %cst : f32 to vector<16x128xf32>
      %19 = arith.subf %18, %17 : vector<16x128xf32>
      %20 = math.exp %19 : vector<16x128xf32>
      %cst_12 = arith.constant 0.000000e+00 : f32
      %21 = vector.broadcast %cst_12 : f32 to vector<16x128xf32>
      %22 = arith.maximumf %14, %21 : vector<16x128xf32>
      %23 = arith.mulf %14, %15 : vector<16x128xf32>
      %24 = arith.subf %22, %23 : vector<16x128xf32>
      %25 = math.log1p %20 : vector<16x128xf32>
      %26 = arith.addf %24, %25 : vector<16x128xf32>
      %cst_13 = arith.constant 0.000000e+00 : f32
      %27 = vector.broadcast %cst_13 : f32 to vector<16x128xf32>
      %28 = arith.cmpf oge, %14, %27 : vector<16x128xf32>
      %cst_14 = arith.constant 1.000000e+00 : f32
      %29 = vector.broadcast %cst_14 : f32 to vector<16x128xf32>
      %30 = arith.select %28, %29, %20 : vector<16x128xi1>, vector<16x128xf32>
      %cst_15 = arith.constant 1.000000e+00 : f32
      %31 = vector.broadcast %cst_15 : f32 to vector<16x128xf32>
      %32 = arith.addf %31, %20 : vector<16x128xf32>
      %33 = arith.divf %30, %32 : vector<16x128xf32>
      %34 = arith.addf %15, %33 : vector<16x128xf32>
      %35 = arith.mulf %15, %33 : vector<16x128xf32>
      %cst_16 = arith.constant 2.000000e+00 : f32
      %36 = vector.broadcast %cst_16 : f32 to vector<16x128xf32>
      %37 = arith.mulf %36, %35 : vector<16x128xf32>
      %38 = arith.subf %34, %37 : vector<16x128xf32>
      %cst_17 = arith.constant 1.000000e+00 : f32
      %39 = vector.broadcast %cst_17 : f32 to vector<16x128xf32>
      %40 = arith.mulf %39, %38 : vector<16x128xf32>
      %41 = arith.addf %26, %40 : vector<16x128xf32>
      %42 = arith.addf %16, %41 : vector<16x128xf32>
      %c0_18 = arith.constant 0 : index
      %c0_19 = arith.constant 0 : index
      %43 = vector.load %arg5[%c0_18, %c0_19] : memref<16x128xf32, #tpu.memory_space<vmem>>, vector<16x128xf32>
      tpu.vector_store %arg5[%c0_18, %c0_19], %42 {strides = array<i32>} : memref<16x128xf32, #tpu.memory_space<vmem>>, vector<16x128xf32>,
    } else {
    }
    %c0_i32_3 = arith.constant 0 : i32
    %8 = arith.cmpi eq, %1, %c0_i32_3 : i32
    %9 = arith.extui %8 : i1 to i32
    %c0_i32_4 = arith.constant 0 : i32
    %10 = arith.cmpi ne, %9, %c0_i32_4 : i32
    scf.if %10 {
      %c0 = arith.constant 0 : index
      %c0_7 = arith.constant 0 : index
      %14 = vector.load %arg2[%c0, %c0_7] : memref<16x128xf32, #tpu.memory_space<vmem>>, vector<16x128xf32>
      %c0_8 = arith.constant 0 : index
      %c0_9 = arith.constant 0 : index
      %15 = vector.load %arg3[%c0_8, %c0_9] : memref<16x128xf32, #tpu.memory_space<vmem>>, vector<16x128xf32>
      %16 = math.absf %14 : vector<16x128xf32>
      %cst = arith.constant 0.000000e+00 : f32
      %17 = vector.broadcast %cst : f32 to vector<16x128xf32>
      %18 = arith.subf %17, %16 : vector<16x128xf32>
      %19 = math.exp %18 : vector<16x128xf32>
      %cst_10 = arith.constant 0.000000e+00 : f32
      %20 = vector.broadcast %cst_10 : f32 to vector<16x128xf32>
      %21 = arith.maximumf %14, %20 : vector<16x128xf32>
      %22 = arith.mulf %14, %15 : vector<16x128xf32>
      %23 = arith.subf %21, %22 : vector<16x128xf32>
      %24 = math.log1p %19 : vector<16x128xf32>
      %25 = arith.addf %23, %24 : vector<16x128xf32>
      %cst_11 = arith.constant 0.000000e+00 : f32
      %26 = vector.broadcast %cst_11 : f32 to vector<16x128xf32>
      %27 = arith.cmpf oge, %14, %26 : vector<16x128xf32>
      %cst_12 = arith.constant 1.000000e+00 : f32
      %28 = vector.broadcast %cst_12 : f32 to vector<16x128xf32>
      %29 = arith.select %27, %28, %19 : vector<16x128xi1>, vector<16x128xf32>
      %cst_13 = arith.constant 1.000000e+00 : f32
      %30 = vector.broadcast %cst_13 : f32 to vector<16x128xf32>
      %31 = arith.addf %30, %19 : vector<16x128xf32>
      %32 = arith.divf %29, %31 : vector<16x128xf32>
      %33 = arith.addf %15, %32 : vector<16x128xf32>
      %34 = arith.mulf %15, %32 : vector<16x128xf32>
      %cst_14 = arith.constant 2.000000e+00 : f32
      %35 = vector.broadcast %cst_14 : f32 to vector<16x128xf32>
      %36 = arith.mulf %35, %34 : vector<16x128xf32>
      %37 = arith.subf %33, %36 : vector<16x128xf32>
      %cst_15 = arith.constant 1.000000e+00 : f32
      %38 = vector.broadcast %cst_15 : f32 to vector<16x128xf32>
      %39 = arith.mulf %38, %37 : vector<16x128xf32>
      %40 = arith.addf %25, %39 : vector<16x128xf32>
      %41 = tpu.iota {dimensions = array<i32: 0>} : vector<16x128xi32>
      %42 = tpu.iota {dimensions = array<i32: 1>} : vector<16x128xi32>
      %c128_i32 = arith.constant 128 : i32
      %43 = vector.broadcast %c128_i32 : i32 to vector<16x128xi32>
      %44 = arith.muli %41, %43 : vector<16x128xi32>
      %c0_i32_16 = arith.constant 0 : i32
      %45 = vector.broadcast %c0_i32_16 : i32 to vector<16x128xi32>
      %46 = arith.addi %45, %44 : vector<16x128xi32>
      %47 = arith.addi %46, %42 : vector<16x128xi32>
      %c2048_i32 = arith.constant 2048 : i32
      %48 = vector.broadcast %c2048_i32 : i32 to vector<16x128xi32>
      %49 = arith.cmpi slt, %47, %48 : vector<16x128xi32>
      %c0_17 = arith.constant 0 : index
      %c0_18 = arith.constant 0 : index
      %50 = vector.load %arg5[%c0_17, %c0_18] : memref<16x128xf32, #tpu.memory_space<vmem>>, vector<16x128xf32>
      %cst_19 = arith.constant 0.000000e+00 : f32
      %51 = vector.broadcast %cst_19 : f32 to vector<16x128xf32>
      %52 = arith.select %49, %40, %51 : vector<16x128xi1>, vector<16x128xf32>
      %53 = arith.addf %50, %52 : vector<16x128xf32>
      %c0_20 = arith.constant 0 : index
      %c0_21 = arith.constant 0 : index
      %54 = vector.load %arg5[%c0_20, %c0_21] : memref<16x128xf32, #tpu.memory_space<vmem>>, vector<16x128xf32>
      tpu.vector_store %arg5[%c0_20, %c0_21], %53 {strides = array<i32>} : memref<16x128xf32, #tpu.memory_space<vmem>>, vector<16x128xf32>,
    } else {
    }
    %c0_i32_5 = arith.constant 0 : i32
    %11 = arith.cmpi eq, %arg1, %c0_i32_5 : i32
    %12 = arith.extui %11 : i1 to i32
    %c0_i32_6 = arith.constant 0 : i32
    %13 = arith.cmpi ne, %12, %c0_i32_6 : i32
    scf.if %13 {
      %c0 = arith.constant 0 : index
      %c0_7 = arith.constant 0 : index
      %14 = vector.load %arg5[%c0, %c0_7] : memref<16x128xf32, #tpu.memory_space<vmem>>, vector<16x128xf32>
      %15 = vector.shape_cast %14 : vector<16x128xf32> to vector<2x8x128xf32>
      %cst = arith.constant dense<0.000000e+00> : vector<8x128xf32>
      %16 = vector.multi_reduction <add>, %15, %cst [0] : vector<2x8x128xf32> to vector<8x128xf32>
      %c0_8 = arith.constant 0 : index
      %c0_9 = arith.constant 0 : index
      %17 = vector.load %arg4[%c0_8, %c0_9] : memref<8x128xf32, #tpu.memory_space<vmem>>, vector<8x128xf32>
      tpu.vector_store %arg4[%c0_8, %c0_9], %16 {strides = array<i32>} : memref<8x128xf32, #tpu.memory_space<vmem>>, vector<8x128xf32>,
    } else {
    }
    return
  }
  func.func @transform_0(%arg0: i32, %arg1: i32) -> (i32, i32) {
    %c1_i32 = arith.constant 1 : i32
    %0 = arith.muli %arg0, %c1_i32 : i32
    %1 = arith.addi %0, %arg1 : i32
    %c0_i32 = arith.constant 0 : i32
    %c0_i32_0 = arith.constant 0 : i32
    return %1, %c0_i32 : i32, i32
  }
  func.func @transform_1(%arg0: i32, %arg1: i32) -> (i32, i32) {
    %c1_i32 = arith.constant 1 : i32
    %0 = arith.muli %arg0, %c1_i32 : i32
    %1 = arith.addi %0, %arg1 : i32
    %c0_i32 = arith.constant 0 : i32
    %c0_i32_0 = arith.constant 0 : i32
    return %1, %c0_i32 : i32, i32
  }
  func.func @transform_2(%arg0: i32, %arg1: i32) -> (i32, i32) {
    %c0_i32 = arith.constant 0 : i32
    %c0_i32_0 = arith.constant 0 : i32
    return %arg0, %c0_i32 : i32, i32
  }
}

</mosaic_0001>

<bundles_post_ra>
// kernel: tpu_custom_call.1
= control target key start
LH: loop header
LB: loop body
LE: loop exit
PB: predicated region body
PF: predicated region fallthrough
CT: control target
= control target key end

     0   :  { %7 = vsyncpa [#allocation4], 0  ;;  %s388_s0 = inlined_call_operand.hbm [shape: f32[16,128], index: 0, kind: input, shape index: {}]   ;;  %s389_s1 = inlined_call_operand.hbm [shape: f32[16,128], index: 1, kind: input, shape index: {}]   ;;  %s390_s2 = inlined_call_operand.hbm [shape: f32[8,128], index: 2, kind: output, shape index: {}]  }
   0x1   :  { %8 = vsyncpa [#allocation7], 0 }
   0x2   :  { %9 = vsyncpa [#allocation5], 0  ;;  %s320_s9 = smov [#allocation3]   ;;  %s248_s13 = scalar_lea.hbm %s388_s0, 256 }
   0x3   :  { %s19_s10 = sshll.u32 %s320_s9, 4  ;;  %p249_p0 = scmp.ne.s32.totalorder %s388_s0, %s248_s13  ;;  %s20_s10 = int_to_ptr.vmem [resolvable:$true] %s19_s10 }
   0x4   :  { %p252_p1 = scmp.lt.u32.totalorder %s248_s13, %s388_s0 }
   0x6   :  { %p254_p2 = pnand %p252_p1, %p249_p0 }
   0x8   :  { %257 = shalt.err (!%p254_p2)
}
   0x9   :  { %s258_s18 = scalar_lea.vmem %s20_s10, 256  ;;  %p263_p4 = scmp.lt.s32.totalorder %s20_s10, %s20_s10 }
   0xa   :  { %p259_p3 = scmp.ne.s32.totalorder %s20_s10, %s258_s18  ;;  %p264_p5 = scmp.lt.s32.totalorder %s258_s18, %s258_s18 }
   0xc   :  { %p265_p6 = por %p264_p5, %p263_p4 }
   0xe   :  { %p266_p7 = pnand %p265_p6, %p259_p3 }
  0x10   :  { %269 = shalt.err (!%p266_p7)
}
  0x11   :  { %s321_s19 = smov 128   ;;  %s322_s20 = smov 8  }
  0x12   :  { %25 = dma.hbm_to_vmem [thread:$0]  %s388_s0, 256, %s20_s10, [#allocation4], %s321_s19, %s321_s19, %s322_s20  }
  0x13   :  { %s323_s23 = smov [#allocation6]   ;;  %s270_s27 = scalar_lea.hbm %s389_s1, 256 }
  0x14   :  { %s35_s24 = sshll.u32 %s323_s23, 4  ;;  %p271_p8 = scmp.ne.s32.totalorder %s389_s1, %s270_s27  ;;  %s36_s24 = int_to_ptr.vmem [resolvable:$true] %s35_s24 }
  0x15   :  { %p274_p9 = scmp.lt.u32.totalorder %s270_s27, %s389_s1 }
  0x17   :  { %p276_p10 = pnand %p274_p9, %p271_p8 }
  0x19   :  { %279 = shalt.err (!%p276_p10)
}
  0x1a   :  { %s280_s4 = scalar_lea.vmem %s36_s24, 256  ;;  %p285_p12 = scmp.lt.s32.totalorder %s36_s24, %s36_s24 }
  0x1b   :  { %p281_p11 = scmp.ne.s32.totalorder %s36_s24, %s280_s4  ;;  %p286_p13 = scmp.lt.s32.totalorder %s280_s4, %s280_s4 }
  0x1d   :  { %p287_p0 = por %p286_p13, %p285_p12 }
  0x1f   :  { %p288_p1 = pnand %p287_p0, %p281_p11 }
  0x21   :  { %291 = shalt.err (!%p288_p1)
}
  0x22   :  { %41 = dma.hbm_to_vmem [thread:$0]  %s389_s1, 256, %s36_s24, [#allocation7], %s321_s19, %s321_s19, %s322_s20  }
  0x23   :  { %314 = dma.done.wait [#allocation4], 256  }
  0x24   :  { %315 = vsyncadd [#allocation4], 4294967040 }
  0x25   :  { %316 = dma.done.wait [#allocation7], 256  }
  0x26   :  { %317 = vsyncadd [#allocation7], 4294967040  ;;  %v131_v0 = vld [vmem:[#allocation3] sm:$0xff]  ;;  %v132_v1 = vld [vmem:[#allocation3 + $0x8] sm:$0xff]  ;;  %v189_v12 = vlaneseq  ;;  %s324_s1 = smov [#allocation8]  }
  0x27   :  { %v135_v2 = vand.u32 2147483647, %v131_v0  ;;  %v136_v3 = vand.u32 2147483647, %v132_v1  ;;  %v133_v16 = vld [vmem:[#allocation6] sm:$0xff]  ;;  %v134_v18 = vld [vmem:[#allocation6 + $0x8] sm:$0xff] }
  0x28   :  { %v190_v15 = vshrl.u32 %v189_v12, 7  ;;  %vm169_vm0 = vcmp.ge.f32.partialorder %v131_v0, 0.0  ;;  %vm170_vm1 = vcmp.ge.f32.partialorder %v132_v1, 0.0  ;;  %v143_v22 = vmax.f32 %v131_v0, 0.0  ;;  %s221_s6 = sshll.u32 %s324_s1, 4  ;;  %s222_s6 = int_to_ptr.vmem [resolvable:$true] %s221_s6 }
  0x29   :  { %v137_v4 = vsub.f32 0.0, %v135_v2  ;;  %v138_v5 = vsub.f32 0.0, %v136_v3  ;;  %v145_v23 = vmul.f32 %v133_v16, %v131_v0  ;;  %v144_v26 = vmax.f32 %v132_v1, 0.0  ;;  %s292_s7 = scalar_lea.vmem %s222_s6, 128  ;;  %p297_p3 = scmp.lt.s32.totalorder %s222_s6, %s222_s6 }
  0x2a   :  { %v191_v24 = vadd.s32 8, %v190_v15  ;;  %v146_v27 = vmul.f32 %v134_v18, %v132_v1  ;;  %v193_v38 = vand.u32 127, %v189_v12  ;;  %v194_v39 = vmul.u32 128, %v190_v15  ;;  %p293_p2 = scmp.ne.s32.totalorder %s222_s6, %s292_s7  ;;  %p298_p4 = scmp.lt.s32.totalorder %s292_s7, %s292_s7 }
  0x2b   :  { %v139_v6 = vmul.f32 1.442695, %v137_v4  ;;  %v141_v7 = vmul.f32 1.442695, %v138_v5  ;;  %v147_v41 = vsub.f32 %v143_v22, %v145_v23 }
  0x2c   :  { %v195_v43 = vmul.u32 128, %v191_v24  ;;  %v148_v44 = vsub.f32 %v144_v26, %v146_v27  ;;  %v196_v52 = vadd.s32 %v194_v39, %v193_v38  ;;  %p299_p5 = por %p298_p4, %p297_p3 }
  0x2d   :  { %236 = vpow2.f32 %v139_v6 }
  0x2e   :  { %238 = vpow2.f32 %v141_v7  ;;  %v197_v55 = vadd.s32 %v195_v43, %v193_v38  ;;  %vm198_vm4 = vcmp.lt.s32.totalorder %v196_v52, 2048  ;;  %p300_p6 = pnand %p299_p5, %p293_p2 }
  0x30   :  { %vm199_vm5 = vcmp.lt.s32.totalorder %v197_v55, 2048 }
  0x37   :  { %v237_v8 = vpop.eup %236 }
  0x38   :  { %v239_v9 = vpop.eup %238  ;;  %v149_v10 = vadd.f32 1.0, %v237_v8  ;;  %v152_v13 = vmul.f32 -0.5, %v237_v8  ;;  %v155_v19 = vand.u32 2147483647, %v237_v8  ;;  %v171_v29 = vsel %vm169_vm0, 1.0, %v237_v8 }
  0x39   :  { %v158_v11 = vadd.f32 1.0, %v239_v9  ;;  %v161_v14 = vmul.f32 -0.5, %v239_v9  ;;  %v164_v21 = vand.u32 2147483647, %v239_v9  ;;  %v172_v34 = vsel %vm170_vm1, 1.0, %v239_v9 }
  0x3a   :  { %240 = vlog2.f32 %v149_v10  ;;  %v153_v17 = vadd.f32 1.0, %v152_v13  ;;  %vm364_vm2 = vcmp.lt.f32.partialorder %v155_v19, 0.0004427343 }
  0x3b   :  { %242 = vlog2.f32 %v158_v11  ;;  %v162_v20 = vadd.f32 1.0, %v161_v14  ;;  %vm368_vm3 = vcmp.lt.f32.partialorder %v164_v21, 0.0004427343 }
  0x3c   :  { %244 = vrcp.f32 %v149_v10  ;;  %v154_v28 = vmul.f32 %v237_v8, %v153_v17 }
  0x3d   :  { %246 = vrcp.f32 %v158_v11  ;;  %v163_v33 = vmul.f32 %v239_v9, %v162_v20 }
  0x44   :  { %v241_v25 = vpop.eup %240 }
  0x45   :  { %v243_v30 = vpop.eup %242  ;;  %v151_v31 = vmul.f32 0.6931472, %v241_v25 }
  0x46   :  { %v245_v35 = vpop.eup %244  ;;  %v160_v36 = vmul.f32 0.6931472, %v243_v30 }
  0x47   :  { %v247_v40 = vpop.eup %246  ;;  %v176_v42 = vmul.f32 %v245_v35, %v171_v29  ;;  %v157_v45 = vsel %vm364_vm2, %v154_v28, %v151_v31 }
  0x48   :  { %v178_v46 = vmul.f32 %v247_v40, %v172_v34  ;;  %v166_v47 = vsel %vm368_vm3, %v163_v33, %v160_v36  ;;  %v167_v53 = vadd.f32 %v157_v45, %v147_v41 }
  0x49   :  { %v179_v48 = vadd.f32 %v176_v42, %v133_v16  ;;  %v181_v49 = vmul.f32 %v176_v42, %v133_v16  ;;  %v168_v56 = vadd.f32 %v166_v47, %v148_v44 }
  0x4a   :  { %v180_v50 = vadd.f32 %v178_v46, %v134_v18  ;;  %v182_v51 = vmul.f32 %v178_v46, %v134_v18 }
  0x4b   :  { %v183_v54 = vmul.f32 2.0, %v181_v49 }
  0x4c   :  { %v184_v57 = vmul.f32 2.0, %v182_v51 }
  0x4d   :  { %v185_v58 = vsub.f32 %v179_v48, %v183_v54 }
  0x4e   :  { %v186_v59 = vsub.f32 %v180_v50, %v184_v57 }
  0x4f   :  { %v187_v60 = vadd.f32 %v185_v58, %v167_v53 }
  0x50   :  { %v188_v61 = vadd.f32 %v186_v59, %v168_v56 }
  0x51   :  { %v202_v62 = vsel %vm198_vm4, %v187_v60, 0.0 }
  0x52   :  { %v203_v63 = vsel %vm199_vm5, %v188_v61, 0.0 }
  0x53   :  { %v213_v0 = vadd.f32 %v203_v63, %v202_v62 }
  0x55   :  { %214 = vst [vmem:[#allocation8] sm:$0xff] %v213_v0 }
  0x56   :  { %303 = shalt.err (!%p300_p6)
}
  0x57   :  { %s304_s10 = scalar_lea.hbm %s390_s2, 128 }
  0x58   :  { %p305_p7 = scmp.ne.s32.totalorder %s390_s2, %s304_s10  ;;  %p308_p8 = scmp.lt.u32.totalorder %s304_s10, %s390_s2 }
  0x5a   :  { %p310_p9 = pnand %p308_p8, %p305_p7 }
  0x5c   :  { %313 = shalt.err (!%p310_p9)
}
  0x5d   :  { %224 = dma.vmem_to_hbm [thread:$0]  %s222_s6, 128, %s390_s2, [#allocation5]  }
  0x5e   :  { %318 = dma.done.wait [#allocation5], 128  }
  0x5f   :  { %319 = vsyncadd [#allocation5], 4294967168 }
  0x60   :  { %228 = vsyncpa [#allocation4], 1 }
  0x61   :  { %229 = vsyncpa [#allocation7], 1 }
  0x62   :  { %230 = vsyncpa [#allocation5], 1 }

</bundles_post_ra>
